<compile_context>
chip_gen: v5e
topology: v5e:2x2
jax: 0.10.0
libtpu: 0.0.40
codegen_flags: <defaults>
</compile_context>

<pallas_src>
import functools

import jax
import jax.numpy as jnp
from jax.experimental import pallas as pl
from jax.experimental.pallas import tpu as pltpu


def _round_up(x, m):
    return ((x + m - 1) // m) * m


def _mlp_kernel(x_ref, w1_ref, b1_ref, w2_ref, b2_ref, o_ref, acc_ref):
    """One (row-tile, H-chunk) grid step of relu(x@W1+b1)@W2+b2."""
    h_idx = pl.program_id(1)

    @pl.when(h_idx == 0)
    def _():
        acc_ref[...] = jnp.zeros_like(acc_ref)

    # Layer 1 on this H chunk: bf16 MXU matmul, f32 accumulation, bias + ReLU
    # on the VPU.  ReLU is elementwise over hidden units, so per-chunk is exact.
    h = jnp.dot(x_ref[...], w1_ref[...], preferred_element_type=jnp.float32)
    h = jnp.maximum(h + b1_ref[...], 0.0)          # b1 is (1, TH), broadcasts

    # Hidden chunk stays in vregs (no VMEM round-trip); single downcast, then
    # the second MXU pass accumulates into the f32 output accumulator.
    acc_ref[...] += jnp.dot(h.astype(jnp.bfloat16), w2_ref[...],
                            preferred_element_type=jnp.float32)

    @pl.when(h_idx == pl.num_programs(1) - 1)
    def _():
        o_ref[...] = (acc_ref[...] + b2_ref[...]).astype(o_ref.dtype)


def _vmem_budget_bytes():
    # Generation-aware budget: ~80% of physical VMEM (64 MiB/TC on v7x,
    # 128 MiB on v5e/v6e), leaving headroom for Mosaic internal scratch and
    # pipeline bookkeeping.
    try:
        phys = pltpu.get_tpu_info().vmem_capacity_bytes
    except Exception:
        phys = 64 * 1024 * 1024
    return int(phys * 0.80)


@functools.partial(jax.jit, static_argnames=("d_out", "tm_target"))
def _two_layer_net_padded(x, w1p, b1p, w2p, b2p, *, d_out, tm_target):
    """x: (N, D_in) unpadded; w1p/b1p/w2p/b2p already padded + bf16/f32 cast."""
    N, D_in = x.shape
    D_in_p, H_p = w1p.shape
    D_out_p = w2p.shape[1]
    out_dtype = x.dtype
    out_isize = jnp.dtype(out_dtype).itemsize

    # ---- row tiling: 16-row alignment (bf16 packs 2 rows/sublane); make sure
    # there are >= 2 grid steps for N > 128 so v7x's two TCs both get work.
    n16 = _round_up(N, 16)
    if n16 <= 128:
        TM = n16
    else:
        TM = min(tm_target, _round_up(pl.cdiv(n16, 2), 16))

    budget = _vmem_budget_bytes()

    def footprint(tm, th):
        # Pallas double-buffers every BlockSpec-tiled input/output by default.
        dbuf = 2
        weights = dbuf * (D_in_p * th * 2 + th * 4 + th * D_out_p * 2 + D_out_p * 4)
        io = dbuf * (tm * D_in_p * 2 + tm * D_out_p * out_isize)
        acc = tm * D_out_p * 4
        return weights + io + acc

    # ---- H tiling: largest 128-multiple divisor of H_p that fits the budget.
    # grid_h == 1 means the weights are fully VMEM-resident (fast path).
    m = H_p // 128
    th_candidates = [H_p // k for k in range(1, m + 1) if m % k == 0]
    TH = th_candidates[-1]
    for cand in th_candidates:          # descending TH; first fit = largest
        if footprint(TM, cand) <= budget:
            TH = cand
            break

    # If even TH == 128 does not fit (very large D_in), shrink the row tile.
    while footprint(TM, TH) > budget and TM > 16:
        TM = max(16, _round_up(TM // 2, 16))
    # TODO(synk): if footprint(TM, TH) still exceeds the budget (enormous
    # D_in), a D_in-tiled reduction for layer 1 would be needed.

    N_p = _round_up(n16, TM)
    grid_m = N_p // TM
    grid_h = H_p // TH

    # ---- per-call x padding (zero padding is exact through matmul/bias/ReLU;
    # padded rows/cols are sliced off below).
    xp = jnp.zeros((N_p, D_in_p), jnp.bfloat16).at[:N, :D_in].set(
        x.astype(jnp.bfloat16))

    vmem_needed = footprint(TM, TH)
    compiler_kwargs = dict(dimension_semantics=("parallel", "arbitrary"))
    if vmem_needed > 30 * 1024 * 1024:
        compiler_kwargs["vmem_limit_bytes"] = min(int(vmem_needed * 1.25), budget)

    cost = pl.CostEstimate(
        flops=2 * N_p * (D_in_p * H_p + H_p * D_out_p),
        transcendentals=0,
        bytes_accessed=(xp.size * 2 + w1p.size * 2 + w2p.size * 2
                        + b1p.size * 4 + b2p.size * 4
                        + N_p * D_out_p * out_isize),
    )

    out_padded = pl.pallas_call(
        _mlp_kernel,
        out_shape=jax.ShapeDtypeStruct((N_p, D_out_p), out_dtype),
        grid=(grid_m, grid_h),
        in_specs=[
            pl.BlockSpec((TM, D_in_p), lambda i, h: (i, 0)),    # x row tile
            pl.BlockSpec((D_in_p, TH), lambda i, h: (0, h)),    # W1 H-chunk
            pl.BlockSpec((1, TH), lambda i, h: (0, h)),         # b1 H-chunk
            pl.BlockSpec((TH, D_out_p), lambda i, h: (h, 0)),   # W2 H-chunk
            pl.BlockSpec((1, D_out_p), lambda i, h: (0, 0)),    # b2 resident
        ],
        out_specs=pl.BlockSpec((TM, D_out_p), lambda i, h: (i, 0)),
        scratch_shapes=[pltpu.VMEM((TM, D_out_p), jnp.float32)],
        compiler_params=pltpu.CompilerParams(**compiler_kwargs),
        cost_estimate=cost,
    )(xp, w1p, b1p, w2p, b2p)

    return out_padded[:N, :d_out]


def make_two_layer_net(w1, b1, w2, b2, *, tm_target=512):
    """Build a jitted forward fn computing relu(x @ w1 + b1) @ w2 + b2.

    Weight padding / bf16 cast happens ONCE here (hoisted out of the per-call
    path).  Only x is padded per call, inside the jitted kernel wrapper.
    w1: (D_in, H); b1: (H,); w2: (H, D_out); b2: (D_out,).
    """
    D_in, H = w1.shape
    D_out = w2.shape[1]
    D_in_p = _round_up(D_in, 128)
    H_p = _round_up(H, 128)
    D_out_p = _round_up(D_out, 128)

    w1p = jnp.zeros((D_in_p, H_p), jnp.bfloat16).at[:D_in, :H].set(
        w1.astype(jnp.bfloat16))
    w2p = jnp.zeros((H_p, D_out_p), jnp.bfloat16).at[:H, :D_out].set(
        w2.astype(jnp.bfloat16))
    b1p = jnp.zeros((1, H_p), jnp.float32).at[0, :H].set(b1.astype(jnp.float32))
    b2p = jnp.zeros((1, D_out_p), jnp.float32).at[0, :D_out].set(
        b2.astype(jnp.float32))

    def fwd(x):
        return _two_layer_net_padded(x, w1p, b1p, w2p, b2p,
                                     d_out=D_out, tm_target=tm_target)

    return fwd


if __name__ == "__main__":
    # Classic shapes for this tutorial module: x is (N, D_in).
    N, D_in, H, D_out = 64, 1000, 100, 10

    key = jax.random.PRNGKey(0)
    kx, kw1, kb1, kw2, kb2 = jax.random.split(key, 5)

    x = jax.random.normal(kx, (N, D_in), dtype=jnp.float32)

    # PyTorch nn.Linear stores weight as (out_features, in_features); generate
    # in that convention (scaled ~1/sqrt(fan_in) like its default init) then
    # transpose to the kernel's (in, out) layout.
    w1_torch = jax.random.normal(kw1, (H, D_in), dtype=jnp.float32) / jnp.sqrt(D_in)
    b1 = jax.random.normal(kb1, (H,), dtype=jnp.float32) * 0.1
    w2_torch = jax.random.normal(kw2, (D_out, H), dtype=jnp.float32) / jnp.sqrt(H)
    b2 = jax.random.normal(kb2, (D_out,), dtype=jnp.float32) * 0.1

    w1 = w1_torch.T  # (D_in, H)
    w2 = w2_torch.T  # (H, D_out)

    forward = make_two_layer_net(w1, b1, w2, b2)
    y = forward(x)
    y = jax.block_until_ready(y)

    # Pure-JAX f32 reference; tolerance accounts for bf16 operand rounding.
    ref = jnp.maximum(x @ w1 + b1, 0.0) @ w2 + b2
    assert y.shape == (N, D_out)
    assert jnp.allclose(y, ref, atol=5e-2, rtol=5e-2), float(
        jnp.max(jnp.abs(y - ref)))

    print("KERNEL_OK")
</pallas_src>

<mosaic_0001>
module attributes {stable_mosaic.version = 11 : i64} {
  func.func @_mlp_kernel(%arg0: i32, %arg1: i32, %arg2: memref<64x1024xbf16, #tpu.memory_space<vmem>>, %arg3: memref<1024x128xbf16, #tpu.memory_space<vmem>>, %arg4: memref<1x128xf32, #tpu.memory_space<vmem>>, %arg5: memref<128x128xbf16, #tpu.memory_space<vmem>>, %arg6: memref<1x128xf32, #tpu.memory_space<vmem>>, %arg7: memref<64x128xf32, #tpu.memory_space<vmem>>, %arg8: memref<64x128xf32, #tpu.memory_space<vmem>>) attributes {dimension_semantics = [#tpu.dimension_semantics<parallel>, #tpu.dimension_semantics<arbitrary>], iteration_bounds = array<i64: 1, 1>, scalar_prefetch = 0 : i64, scratch_operands = 1 : i64, tpu.core_type = #tpu.core_type<tc>, window_params = [{transform_indices = @transform_0, window_bounds = array<i64: 64, 1024>}, {transform_indices = @transform_1, window_bounds = array<i64: 1024, 128>}, {transform_indices = @transform_2, window_bounds = array<i64: 1, 128>}, {transform_indices = @transform_3, window_bounds = array<i64: 128, 128>}, {pipeline_mode = #tpu.pipeline_mode<synchronous>, transform_indices = @transform_4, window_bounds = array<i64: 1, 128>}, {transform_indices = @transform_5, window_bounds = array<i64: 64, 128>}]} {
    %c0_i32 = arith.constant 0 : i32
    %0 = arith.cmpi eq, %arg1, %c0_i32 : i32
    %1 = arith.extui %0 : i1 to i32
    %c0_i32_0 = arith.constant 0 : i32
    %2 = arith.cmpi ne, %1, %c0_i32_0 : i32
    scf.if %2 {
      %cst_16 = arith.constant 0.000000e+00 : f32
      %20 = vector.broadcast %cst_16 : f32 to vector<64x128xf32>
      %c0_17 = arith.constant 0 : index
      %c0_18 = arith.constant 0 : index
      %21 = vector.load %arg8[%c0_17, %c0_18] : memref<64x128xf32, #tpu.memory_space<vmem>>, vector<64x128xf32>
      tpu.vector_store %arg8[%c0_17, %c0_18], %20 {strides = array<i32>} : memref<64x128xf32, #tpu.memory_space<vmem>>, vector<64x128xf32>,
    } else {
    }
    %c0 = arith.constant 0 : index
    %c0_1 = arith.constant 0 : index
    %3 = vector.load %arg2[%c0, %c0_1] : memref<64x1024xbf16, #tpu.memory_space<vmem>>, vector<64x1024xbf16>
    %c0_2 = arith.constant 0 : index
    %c0_3 = arith.constant 0 : index
    %4 = vector.load %arg3[%c0_2, %c0_3] : memref<1024x128xbf16, #tpu.memory_space<vmem>>, vector<1024x128xbf16>
    %cst = arith.constant dense<0.000000e+00> : vector<64x128xf32>
    %5 = tpu.matmul %3, %4, %cst {dimension_numbers = #tpu.dot_dimension_numbers<[1], [0], [0], [1], [0, 0, 1, 1], [], []>} : vector<64x1024xbf16>, vector<1024x128xbf16>, vector<64x128xf32> -> vector<64x128xf32>
    %c0_4 = arith.constant 0 : index
    %c0_5 = arith.constant 0 : index
    %6 = vector.load %arg4[%c0_4, %c0_5] : memref<1x128xf32, #tpu.memory_space<vmem>>, vector<1x128xf32>
    %7 = vector.broadcast %6 : vector<1x128xf32> to vector<64x128xf32>
    %8 = arith.addf %5, %7 : vector<64x128xf32>
    %cst_6 = arith.constant 0.000000e+00 : f32
    %9 = vector.broadcast %cst_6 : f32 to vector<64x128xf32>
    %10 = arith.maximumf %8, %9 : vector<64x128xf32>
    %c0_7 = arith.constant 0 : index
    %c0_8 = arith.constant 0 : index
    %11 = vector.load %arg8[%c0_7, %c0_8] : memref<64x128xf32, #tpu.memory_space<vmem>>, vector<64x128xf32>
    %12 = arith.truncf %10 : vector<64x128xf32> to vector<64x128xbf16>
    %c0_9 = arith.constant 0 : index
    %c0_10 = arith.constant 0 : index
    %13 = vector.load %arg5[%c0_9, %c0_10] : memref<128x128xbf16, #tpu.memory_space<vmem>>, vector<128x128xbf16>
    %cst_11 = arith.constant dense<0.000000e+00> : vector<64x128xf32>
    %14 = tpu.matmul %12, %13, %cst_11 {dimension_numbers = #tpu.dot_dimension_numbers<[1], [0], [0], [1], [0, 0, 1, 1], [], []>} : vector<64x128xbf16>, vector<128x128xbf16>, vector<64x128xf32> -> vector<64x128xf32>
    %15 = arith.addf %11, %14 : vector<64x128xf32>
    %c0_12 = arith.constant 0 : index
    %c0_13 = arith.constant 0 : index
    %16 = vector.load %arg8[%c0_12, %c0_13] : memref<64x128xf32, #tpu.memory_space<vmem>>, vector<64x128xf32>
    tpu.vector_store %arg8[%c0_12, %c0_13], %15 {strides = array<i32>} : memref<64x128xf32, #tpu.memory_space<vmem>>, vector<64x128xf32>,
    %c0_i32_14 = arith.constant 0 : i32
    %17 = arith.cmpi eq, %arg1, %c0_i32_14 : i32
    %18 = arith.extui %17 : i1 to i32
    %c0_i32_15 = arith.constant 0 : i32
    %19 = arith.cmpi ne, %18, %c0_i32_15 : i32
    scf.if %19 {
      %c0_16 = arith.constant 0 : index
      %c0_17 = arith.constant 0 : index
      %20 = vector.load %arg8[%c0_16, %c0_17] : memref<64x128xf32, #tpu.memory_space<vmem>>, vector<64x128xf32>
      %c0_18 = arith.constant 0 : index
      %c0_19 = arith.constant 0 : index
      %21 = vector.load %arg6[%c0_18, %c0_19] : memref<1x128xf32, #tpu.memory_space<vmem>>, vector<1x128xf32>
      %22 = vector.broadcast %21 : vector<1x128xf32> to vector<64x128xf32>
      %23 = arith.addf %20, %22 : vector<64x128xf32>
      %c0_20 = arith.constant 0 : index
      %c0_21 = arith.constant 0 : index
      %24 = vector.load %arg7[%c0_20, %c0_21] : memref<64x128xf32, #tpu.memory_space<vmem>>, vector<64x128xf32>
      tpu.vector_store %arg7[%c0_20, %c0_21], %23 {strides = array<i32>} : memref<64x128xf32, #tpu.memory_space<vmem>>, vector<64x128xf32>,
    } else {
    }
    return
  }
  func.func @transform_0(%arg0: i32, %arg1: i32) -> (i32, i32) {
    %c0_i32 = arith.constant 0 : i32
    %c0_i32_0 = arith.constant 0 : i32
    return %arg0, %c0_i32 : i32, i32
  }
  func.func @transform_1(%arg0: i32, %arg1: i32) -> (i32, i32) {
    %c0_i32 = arith.constant 0 : i32
    %c0_i32_0 = arith.constant 0 : i32
    return %c0_i32, %arg1 : i32, i32
  }
  func.func @transform_2(%arg0: i32, %arg1: i32) -> (i32, i32) {
    %c0_i32 = arith.constant 0 : i32
    %c0_i32_0 = arith.constant 0 : i32
    return %c0_i32, %arg1 : i32, i32
  }
  func.func @transform_3(%arg0: i32, %arg1: i32) -> (i32, i32) {
    %c0_i32 = arith.constant 0 : i32
    %c0_i32_0 = arith.constant 0 : i32
    return %arg1, %c0_i32 : i32, i32
  }
  func.func @transform_4(%arg0: i32, %arg1: i32) -> (i32, i32) {
    %c0_i32 = arith.constant 0 : i32
    %c0_i32_0 = arith.constant 0 : i32
    %c0_i32_1 = arith.constant 0 : i32
    return %c0_i32, %c0_i32_0 : i32, i32
  }
  func.func @transform_5(%arg0: i32, %arg1: i32) -> (i32, i32) {
    %c0_i32 = arith.constant 0 : i32
    %c0_i32_0 = arith.constant 0 : i32
    return %arg0, %c0_i32 : i32, i32
  }
}

</mosaic_0001>

<bundles_post_ra>
// kernel: _two_layer_net_padded.1
= control target key start
LH: loop header
LB: loop body
LE: loop exit
PB: predicated region body
PF: predicated region fallthrough
CT: control target
= control target key end

     0   :  { %s2200_s1 = inlined_call_operand.vmem [shape: bf16[1024,128], index: 1, kind: input, shape index: {}]   ;;  %s2201_s2 = inlined_call_operand.vmem [shape: f32[1,128], index: 2, kind: input, shape index: {}]   ;;  %s2202_s0 = inlined_call_operand.vmem [shape: bf16[64,1024], index: 0, kind: input, shape index: {}]   ;;  %s2203_s4 = inlined_call_operand.vmem [shape: f32[1,128], index: 4, kind: input, shape index: {}]   ;;  %s2204_s3 = inlined_call_operand.vmem [shape: bf16[128,128], index: 3, kind: input, shape index: {}]   ;;  %s2205_s5 = inlined_call_operand.vmem [shape: f32[64,128], index: 5, kind: output, shape index: {}]  }
   0x1   :  { %v1591_v0 = vld [vmem:[%s2200_s1 + $0x38] sm:$0xff]  ;;  %v1590_v1 = vld [vmem:[%s2200_s1 + $0x30] sm:$0xff]  ;;  %v1589_v6 = vld [vmem:[%s2200_s1 + $0x28] sm:$0xff] }
   0x2   :  { %1656 = vmatpush.bf16.msra.mxu1 %v1591_v0  ;;  %740 = vmatpush.bf16.msra.mxu0 %v1591_v0  ;;  %v1607_v2 = vld [vmem:[%s2200_s1 + $0xb8] sm:$0xff]  ;;  %v1606_v4 = vld [vmem:[%s2200_s1 + $0xb0] sm:$0xff]  ;;  %v1605_v7 = vld [vmem:[%s2200_s1 + $0xa8] sm:$0xff] }
   0x3   :  { %v1615_v3 = vld [vmem:[%s2200_s1 + $0xf8] sm:$0xff]  ;;  %798 = vmatpush.bf16.msra.mxu2 %v1607_v2  ;;  %v1614_v5 = vld [vmem:[%s2200_s1 + $0xf0] sm:$0xff]  ;;  %v1613_v8 = vld [vmem:[%s2200_s1 + $0xe8] sm:$0xff] }
   0x4   :  { %827 = vmatpush.bf16.msra.mxu3 %v1615_v3  ;;  %v1588_v9 = vld [vmem:[%s2200_s1 + $0x20] sm:$0xff]  ;;  %v1587_v12 = vld [vmem:[%s2200_s1 + $0x18] sm:$0xff]  ;;  %v1586_v15 = vld [vmem:[%s2200_s1 + $0x10] sm:$0xff] }
   0x5   :  { %v1604_v10 = vld [vmem:[%s2200_s1 + $0xa0] sm:$0xff]  ;;  %v1603_v13 = vld [vmem:[%s2200_s1 + $0x98] sm:$0xff]  ;;  %v1602_v16 = vld [vmem:[%s2200_s1 + $0x90] sm:$0xff] }
   0x6   :  { %1657 = vmatpush.bf16.msra.mxu1 %v1590_v1  ;;  %741 = vmatpush.bf16.msra.mxu0 %v1590_v1  ;;  %v1612_v11 = vld [vmem:[%s2200_s1 + $0xe0] sm:$0xff]  ;;  %v1611_v14 = vld [vmem:[%s2200_s1 + $0xd8] sm:$0xff]  ;;  %v1610_v17 = vld [vmem:[%s2200_s1 + $0xd0] sm:$0xff] }
   0x7   :  { %799 = vmatpush.bf16.msra.mxu2 %v1606_v4  ;;  %v1585_v18 = vld [vmem:[%s2200_s1 + $0x8] sm:$0xff]  ;;  %v1584_v21 = vld [vmem:[%s2200_s1] sm:$0xff]  ;;  %v1599_v26 = vld [vmem:[%s2200_s1 + $0x78] sm:$0xff] }
   0x8   :  { %828 = vmatpush.bf16.msra.mxu3 %v1614_v5  ;;  %v1601_v19 = vld [vmem:[%s2200_s1 + $0x88] sm:$0xff]  ;;  %v1202_v22 = vld [vmem:[%s2202_s0 + $0x80] sm:$0xf]  ;;  %v1623_v27 = vld [vmem:[%s2200_s1 + $0x138] sm:$0xff] }
   0x9   :  { %v1609_v20 = vld [vmem:[%s2200_s1 + $0xc8] sm:$0xff]  ;;  %v1572_v23 = vld [vmem:[%s2202_s0 + $0x9c] sm:$0xf0]  ;;  %v1639_v36 = vld [vmem:[%s2200_s1 + $0x1b8] sm:$0xff] }
   0xa   :  { %1658 = vmatpush.bf16.msra.mxu1 %v1589_v6  ;;  %742 = vmatpush.bf16.msra.mxu0 %v1589_v6  ;;  %v1138_v24 = vld [vmem:[%s2202_s0] sm:$0xf]  ;;  %v1146_v30 = vld [vmem:[%s2202_s0 + $0x8] sm:$0xf]  ;;  %v1203_v31 = vor.u32 %v1572_v23, %v1202_v22  ;;  %v1553_v34 = vld [vmem:[%s2202_s0 + $0xc] sm:$0xf] }
   0xb   :  { %800 = vmatpush.bf16.msra.mxu2 %v1605_v7  ;;  %v1556_v25 = vld [vmem:[%s2202_s0 + $0x1c] sm:$0xf0]  ;;  %v1557_v33 = vld [vmem:[%s2202_s0 + $0x24] sm:$0xf0]  ;;  %v1148_v35 = vld [vmem:[%s2202_s0 + $0x28] sm:$0xf0] }
   0xc   :  { %829 = vmatpush.bf16.msra.mxu3 %v1613_v8  ;;  %v1600_v28 = vld [vmem:[%s2200_s1 + $0x80] sm:$0xff]  ;;  %v1139_v32 = vor.u32 %v1556_v25, %v1138_v24  ;;  %v1647_v37 = vld [vmem:[%s2200_s1 + $0x1f8] sm:$0xff]  ;;  %v1598_v38 = vld [vmem:[%s2200_s1 + $0x70] sm:$0xff]  ;;  %v1147_v40 = vor.u32 %v1557_v33, %v1146_v30  ;;  %v1151_v41 = vor.u32 %v1553_v34, %v1148_v35 }
   0xd   :  { %v1608_v29 = vld [vmem:[%s2200_s1 + $0xc0] sm:$0xff]  ;;  %v1622_v39 = vld [vmem:[%s2200_s1 + $0x130] sm:$0xff]  ;;  %v1597_v43 = vld [vmem:[%s2200_s1 + $0x68] sm:$0xff] }
   0xe   :  { %1659 = vmatpush.bf16.msra.mxu1 %v1588_v9  ;;  %743 = vmatpush.bf16.msra.mxu0 %v1588_v9  ;;  %v1638_v42 = vld [vmem:[%s2200_s1 + $0x1b0] sm:$0xff]  ;;  %v1621_v44 = vld [vmem:[%s2200_s1 + $0x128] sm:$0xff]  ;;  %v1596_v48 = vld [vmem:[%s2200_s1 + $0x60] sm:$0xff] }
   0xf   :  { %801 = vmatpush.bf16.msra.mxu2 %v1604_v10  ;;  %v1646_v45 = vld [vmem:[%s2200_s1 + $0x1f0] sm:$0xff]  ;;  %v1637_v46 = vld [vmem:[%s2200_s1 + $0x1a8] sm:$0xff]  ;;  %v1620_v49 = vld [vmem:[%s2200_s1 + $0x120] sm:$0xff] }
  0x10   :  { %830 = vmatpush.bf16.msra.mxu3 %v1612_v11  ;;  %v1645_v47 = vld [vmem:[%s2200_s1 + $0x1e8] sm:$0xff]  ;;  %v1234_v50 = vld [vmem:[%s2202_s0 + $0xc0] sm:$0xf]  ;;  %v1595_v54 = vld [vmem:[%s2200_s1 + $0x58] sm:$0xff] }
  0x11   :  { %v1580_v51 = vld [vmem:[%s2202_s0 + $0xdc] sm:$0xf0]  ;;  %v1619_v55 = vld [vmem:[%s2200_s1 + $0x118] sm:$0xff]  ;;  %v1178_v56 = vld [vmem:[%s2202_s0 + $0x48] sm:$0xf] }
  0x12   :  { %1660 = vmatpush.bf16.msra.mxu1 %v1587_v12  ;;  %744 = vmatpush.bf16.msra.mxu0 %v1587_v12  ;;  %v1170_v52 = vld [vmem:[%s2202_s0 + $0x40] sm:$0xf]  ;;  %v1235_v57 = vor.u32 %v1580_v51, %v1234_v50  ;;  %v1565_v59 = vld [vmem:[%s2202_s0 + $0x64] sm:$0xf0]  ;;  %v1561_v60 = vld [vmem:[%s2202_s0 + $0x4c] sm:$0xf] }
  0x13   :  { %802 = vmatpush.bf16.msra.mxu2 %v1603_v13  ;;  %v1564_v53 = vld [vmem:[%s2202_s0 + $0x5c] sm:$0xf0]  ;;  %v1180_v61 = vld [vmem:[%s2202_s0 + $0x68] sm:$0xf0]  ;;  %v1594_v62 = vld [vmem:[%s2200_s1 + $0x50] sm:$0xff]  ;;  %v1179_v0 = vor.u32 %v1565_v59, %v1178_v56 }
  0x14   :  { %831 = vmatpush.bf16.msra.mxu3 %v1611_v14  ;;  %v1171_v58 = vor.u32 %v1564_v53, %v1170_v52  ;;  %v1618_v63 = vld [vmem:[%s2200_s1 + $0x110] sm:$0xff]  ;;  %v1183_v1 = vor.u32 %v1561_v60, %v1180_v61  ;;  %v1636_v2 = vld [vmem:[%s2200_s1 + $0x1a0] sm:$0xff]  ;;  %v1593_v3 = vld [vmem:[%s2200_s1 + $0x48] sm:$0xff] }
  0x15   :  { %v1617_v4 = vld [vmem:[%s2200_s1 + $0x108] sm:$0xff]  ;;  %v1644_v5 = vld [vmem:[%s2200_s1 + $0x1e0] sm:$0xff]  ;;  %v1635_v6 = vld [vmem:[%s2200_s1 + $0x198] sm:$0xff] }
  0x16   :  { %1661 = vmatpush.bf16.msra.mxu1 %v1586_v15  ;;  %745 = vmatpush.bf16.msra.mxu0 %v1586_v15  ;;  %v1643_v7 = vld [vmem:[%s2200_s1 + $0x1d8] sm:$0xff]  ;;  %v1592_v8 = vld [vmem:[%s2200_s1 + $0x40] sm:$0xff]  ;;  %v1154_v13 = vld [vmem:[%s2202_s0 + $0x10] sm:$0xf] }
  0x17   :  { %803 = vmatpush.bf16.msra.mxu2 %v1602_v16  ;;  %v1616_v9 = vld [vmem:[%s2200_s1 + $0x100] sm:$0xff]  ;;  %v1631_v10 = vld [vmem:[%s2200_s1 + $0x178] sm:$0xff]  ;;  %v1558_v14 = vld [vmem:[%s2202_s0 + $0x2c] sm:$0xf0] }
  0x18   :  { %832 = vmatpush.bf16.msra.mxu3 %v1610_v17  ;;  %v1552_v11 = vld [vmem:[%s2202_s0 + $0x4] sm:$0xf]  ;;  %v1630_v15 = vld [vmem:[%s2200_s1 + $0x170] sm:$0xff]  ;;  %v1155_v17 = vor.u32 %v1558_v14, %v1154_v13  ;;  %v1629_v22 = vld [vmem:[%s2200_s1 + $0x168] sm:$0xff] }
  0x19   :  { %v1140_v12 = vld [vmem:[%s2202_s0 + $0x20] sm:$0xf0]  ;;  %v1634_v25 = vld [vmem:[%s2200_s1 + $0x190] sm:$0xff]  ;;  %v1627_v30 = vld [vmem:[%s2200_s1 + $0x158] sm:$0xff] }
  0x1a   :  { %1662 = vmatpush.bf16.msra.mxu1 %v1585_v18  ;;  %746 = vmatpush.bf16.msra.mxu0 %v1585_v18  ;;  %v1143_v16 = vor.u32 %v1552_v11, %v1140_v12  ;;  %v1210_v18 = vld [vmem:[%s2202_s0 + $0x88] sm:$0xf]  ;;  %v1186_v33 = vld [vmem:[%s2202_s0 + $0x50] sm:$0xf]  ;;  %v1555_v56 = vld [vmem:[%s2202_s0 + $0x1c] sm:$0xf] }
  0x1b   :  { %804 = vmatpush.bf16.msra.mxu2 %v1601_v19  ;;  %v1573_v19 = vld [vmem:[%s2202_s0 + $0xa4] sm:$0xf0]  ;;  %v1566_v34 = vld [vmem:[%s2202_s0 + $0x6c] sm:$0xf0]  ;;  %v1576_v60 = vld [vmem:[%s2202_s0 + $0xc4] sm:$0xf] }
  0x1c   :  { %833 = vmatpush.bf16.msra.mxu3 %v1609_v20  ;;  %v1569_v20 = vld [vmem:[%s2202_s0 + $0x8c] sm:$0xf]  ;;  %v1211_v23 = vor.u32 %v1573_v19, %v1210_v18  ;;  %v1626_v35 = vld [vmem:[%s2200_s1 + $0x150] sm:$0xff]  ;;  %v1236_v61 = vld [vmem:[%s2202_s0 + $0xe0] sm:$0xf0] }
  0x1d   :  { %v1218_v50 = vld [vmem:[%s2202_s0 + $0x90] sm:$0xf]  ;;  %v1226_v11 = vld [vmem:[%s2202_s0 + $0x98] sm:$0xf]  ;;  %v1571_v13 = vld [vmem:[%s2202_s0 + $0x9c] sm:$0xf] }
  0x1e   :  { %1663 = vmatpush.bf16.msra.mxu1 %v1584_v21  ;;  %747 = vmatpush.bf16.msra.mxu0 %v1584_v21  ;;  %v1212_v21 = vld [vmem:[%s2202_s0 + $0xa8] sm:$0xf0]  ;;  %v1574_v51 = vld [vmem:[%s2202_s0 + $0xac] sm:$0xf0]  ;;  %v1575_v12 = vld [vmem:[%s2202_s0 + $0xb4] sm:$0xf0] }
  0x1f   :  { %805 = vmatpush.bf16.msra.mxu2 %v1600_v28  ;;  %v1215_v24 = vor.u32 %v1569_v20, %v1212_v21  ;;  %v1633_v28 = vld [vmem:[%s2200_s1 + $0x188] sm:$0xff]  ;;  %v1219_v53 = vor.u32 %v1574_v51, %v1218_v50  ;;  %v1228_v14 = vld [vmem:[%s2202_s0 + $0xb8] sm:$0xf0]  ;;  %v1188_v18 = vld [vmem:[%s2202_s0 + $0x70] sm:$0xf0] }
  0x20   :  { %834 = vmatpush.bf16.msra.mxu3 %v1608_v29  ;;  %v1641_v29 = vld [vmem:[%s2200_s1 + $0x1c8] sm:$0xff]  ;;  %v1258_v20 = vld [vmem:[%s2202_s0 + $0xd8] sm:$0xf] }
  0x21   :  { %758 = vmatmul.bf16.vlgmr.msra.gmra.mxu1 %v1203_v31  ;;  %748 = vmatmul.bf16.vlgmr.msra.gmra.mxu0 %v1139_v32  ;;  %v1560_v31 = vld [vmem:[%s2202_s0 + $0x44] sm:$0xf]  ;;  %v1583_v21 = vld [vmem:[%s2202_s0 + $0xf4] sm:$0xf0] }
  0x22   :  { %769 = vmatpush.bf16.msrb.mxu1 %v1599_v26  ;;  %856 = vmatpush.bf16.msrb.mxu0 %v1623_v27  ;;  %v1642_v26 = vld [vmem:[%s2200_s1 + $0x1d0] sm:$0xff]  ;;  %v1628_v27 = vld [vmem:[%s2200_s1 + $0x160] sm:$0xff] }
  0x23   :  { %914 = vmatpush.bf16.msrb.mxu2 %v1639_v36  ;;  %835 = vmatmul.bf16.vlgmr.msra.gmra.mxu3 %v1151_v41  ;;  %v1172_v32 = vld [vmem:[%s2202_s0 + $0x60] sm:$0xf0]  ;;  %v1244_v41 = vld [vmem:[%s2202_s0 + $0xe8] sm:$0xf0] }
  0x24   :  { %943 = vmatpush.bf16.msrb.mxu3 %v1647_v37  ;;  %806 = vmatmul.bf16.vlgmr.msra.gmra.mxu2 %v1147_v40  ;;  %v1175_v36 = vor.u32 %v1560_v31, %v1172_v32  ;;  %v1187_v37 = vor.u32 %v1566_v34, %v1186_v33  ;;  %v1577_v40 = vld [vmem:[%s2202_s0 + $0xcc] sm:$0xf]  ;;  %v1578_v33 = vld [vmem:[%s2202_s0 + $0xd4] sm:$0xf] }
  0x25   :  { %v1252_v34 = vld [vmem:[%s2202_s0 + $0xf0] sm:$0xf0] }
  0x26   :  { %770 = vmatpush.bf16.msrb.mxu1 %v1598_v38  ;;  %857 = vmatpush.bf16.msrb.mxu0 %v1622_v39  ;;  %v1242_v38 = vld [vmem:[%s2202_s0 + $0xc8] sm:$0xf] }
  0x27   :  { %915 = vmatpush.bf16.msrb.mxu2 %v1638_v42  ;;  %v1581_v39 = vld [vmem:[%s2202_s0 + $0xe4] sm:$0xf0] }
  0x28   :  { %944 = vmatpush.bf16.msrb.mxu3 %v1646_v45  ;;  %v1243_v42 = vor.u32 %v1581_v39, %v1242_v38  ;;  %v1625_v45 = vld [vmem:[%s2200_s1 + $0x148] sm:$0xff] }
  0x2a   :  { %771 = vmatpush.bf16.msrb.mxu1 %v1597_v43  ;;  %858 = vmatpush.bf16.msrb.mxu0 %v1621_v44  ;;  %v1632_v43 = vld [vmem:[%s2200_s1 + $0x180] sm:$0xff]  ;;  %v1247_v44 = vor.u32 %v1577_v40, %v1244_v41 }
  0x2b   :  { %916 = vmatpush.bf16.msrb.mxu2 %v1637_v46  ;;  %v1640_v46 = vld [vmem:[%s2200_s1 + $0x1c0] sm:$0xff] }
  0x2c   :  { %945 = vmatpush.bf16.msrb.mxu3 %v1645_v47  ;;  %v1624_v47 = vld [vmem:[%s2200_s1 + $0x140] sm:$0xff] }
  0x2e   :  { %772 = vmatpush.bf16.msrb.mxu1 %v1596_v48  ;;  %859 = vmatpush.bf16.msrb.mxu0 %v1620_v49  ;;  %v1568_v48 = vld [vmem:[%s2202_s0 + $0x84] sm:$0xf] }
  0x2f   :  { %917 = vmatpush.bf16.msrb.mxu2 %v1636_v2  ;;  %v1204_v49 = vld [vmem:[%s2202_s0 + $0xa0] sm:$0xf0]  ;;  %v1194_v2 = vld [vmem:[%s2202_s0 + $0x58] sm:$0xf] }
  0x30   :  { %946 = vmatpush.bf16.msrb.mxu3 %v1644_v5  ;;  %v1207_v52 = vor.u32 %v1568_v48, %v1204_v49  ;;  %v1196_v5 = vld [vmem:[%s2202_s0 + $0x78] sm:$0xf0] }
  0x31   :  { %763 = vmatmul.bf16.gmra.mxu1 %v1235_v57  ;;  %753 = vmatmul.bf16.gmra.mxu0 %v1171_v58  ;;  %v1164_v57 = vld [vmem:[%s2202_s0 + $0x38] sm:$0xf0] }
  0x32   :  { %773 = vmatpush.bf16.msrb.mxu1 %v1595_v54  ;;  %860 = vmatpush.bf16.msrb.mxu0 %v1619_v55  ;;  %v1162_v54 = vld [vmem:[%s2202_s0 + $0x18] sm:$0xf]  ;;  %v1167_v59 = vor.u32 %v1555_v56, %v1164_v57 }
  0x33   :  { %840 = vmatmul.bf16.gmra.mxu3 %v1183_v1  ;;  %918 = vmatpush.bf16.msrb.mxu2 %v1635_v6  ;;  %v1559_v55 = vld [vmem:[%s2202_s0 + $0x34] sm:$0xf0] }
  0x34   :  { %811 = vmatmul.bf16.gmra.mxu2 %v1179_v0  ;;  %947 = vmatpush.bf16.msrb.mxu3 %v1643_v7  ;;  %v1163_v58 = vor.u32 %v1559_v55, %v1162_v54  ;;  %v1239_v0 = vor.u32 %v1576_v60, %v1236_v61  ;;  %v1654_v61 = vld [vmem:[%s2204_s3 + $0x30] sm:$0xff] }
  0x36   :  { %774 = vmatpush.bf16.msrb.mxu1 %v1594_v62  ;;  %861 = vmatpush.bf16.msrb.mxu0 %v1618_v63  ;;  %v1250_v62 = vld [vmem:[%s2202_s0 + $0xd0] sm:$0xf] }
  0x37   :  { %919 = vmatpush.bf16.msrb.mxu2 %v1634_v25  ;;  %v1582_v63 = vld [vmem:[%s2202_s0 + $0xec] sm:$0xf0] }
  0x38   :  { %948 = vmatpush.bf16.msrb.mxu3 %v1642_v26  ;;  %v1251_v1 = vor.u32 %v1582_v63, %v1250_v62  ;;  %v1570_v26 = vld [vmem:[%s2202_s0 + $0x94] sm:$0xf] }
  0x3a   :  { %775 = vmatpush.bf16.msrb.mxu1 %v1593_v3  ;;  %862 = vmatpush.bf16.msrb.mxu0 %v1617_v4  ;;  %v1567_v3 = vld [vmem:[%s2202_s0 + $0x74] sm:$0xf0]  ;;  %v1563_v4 = vld [vmem:[%s2202_s0 + $0x5c] sm:$0xf] }
  0x3b   :  { %920 = vmatpush.bf16.msrb.mxu2 %v1633_v28  ;;  %v1195_v6 = vor.u32 %v1567_v3, %v1194_v2  ;;  %v1199_v7 = vor.u32 %v1563_v4, %v1196_v5  ;;  %v1653_v2 = vld [vmem:[%s2204_s3 + $0x28] sm:$0xff]  ;;  %v1652_v3 = vld [vmem:[%s2204_s3 + $0x20] sm:$0xff] }
  0x3c   :  { %949 = vmatpush.bf16.msrb.mxu3 %v1641_v29 }
  0x3e   :  { %776 = vmatpush.bf16.msrb.mxu1 %v1592_v8  ;;  %863 = vmatpush.bf16.msrb.mxu0 %v1616_v9  ;;  %v1554_v8 = vld [vmem:[%s2202_s0 + $0x14] sm:$0xf] }
  0x3f   :  { %921 = vmatpush.bf16.msrb.mxu2 %v1632_v43  ;;  %v1156_v9 = vld [vmem:[%s2202_s0 + $0x30] sm:$0xf0]  ;;  %v2101_v43 = vld [vmem:[%s2201_s2] ss:$0 sm:$0xff] }
  0x40   :  { %950 = vmatpush.bf16.msrb.mxu3 %v1640_v46 }
  0x41   :  { %777 = vmatmul.bf16.vlgmr.msrb.gmra.mxu1 %v1143_v16  ;;  %864 = vmatmul.bf16.vlgmr.msrb.gmra.mxu0 %v1155_v17  ;;  %v1231_v16 = vor.u32 %v1571_v13, %v1228_v14  ;;  %v1562_v17 = vld [vmem:[%s2202_s0 + $0x54] sm:$0xf] }
  0x42   :  { %885 = vmatpush.bf16.msra.mxu1 %v1631_v10  ;;  %v1159_v10 = vor.u32 %v1554_v8, %v1156_v9  ;;  %v1191_v19 = vor.u32 %v1562_v17, %v1188_v18  ;;  %v1651_v9 = vld [vmem:[%s2204_s3 + $0x18] sm:$0xff]  ;;  %v1650_v13 = vld [vmem:[%s2204_s3 + $0x10] sm:$0xff] }
  0x43   :  { %845 = vmatmul.bf16.gmra.mxu3 %v1215_v24  ;;  %v1259_v24 = vor.u32 %v1583_v21, %v1258_v20 }
  0x44   :  { %816 = vmatmul.bf16.gmra.mxu2 %v1211_v23  ;;  %v1260_v23 = vld [vmem:[%s2202_s0 + $0xf8] sm:$0xf0] }
  0x46   :  { %886 = vmatpush.bf16.msra.mxu1 %v1630_v15  ;;  %v1227_v15 = vor.u32 %v1575_v12, %v1226_v11 }
  0x4a   :  { %887 = vmatpush.bf16.msra.mxu1 %v1629_v22  ;;  %v1579_v22 = vld [vmem:[%s2202_s0 + $0xdc] sm:$0xf] }
  0x4b   :  { %v1263_v25 = vor.u32 %v1579_v22, %v1260_v23 }
  0x4e   :  { %888 = vmatpush.bf16.msra.mxu1 %v1628_v27  ;;  %v1220_v27 = vld [vmem:[%s2202_s0 + $0xb0] sm:$0xf0] }
  0x4f   :  { %v1223_v28 = vor.u32 %v1570_v26, %v1220_v27 }
  0x51   :  { %782 = vmatmul.bf16.gmra.mxu1 %v1175_v36  ;;  %869 = vmatmul.bf16.gmra.mxu0 %v1187_v37 }
  0x52   :  { %889 = vmatpush.bf16.msra.mxu1 %v1627_v30 }
  0x53   :  { %850 = vmatmul.bf16.gmra.mxu3 %v1247_v44 }
  0x54   :  { %821 = vmatmul.bf16.gmra.mxu2 %v1243_v42 }
  0x56   :  { %890 = vmatpush.bf16.msra.mxu1 %v1626_v35  ;;  %v1255_v35 = vor.u32 %v1578_v33, %v1252_v34 }
  0x5a   :  { %891 = vmatpush.bf16.msra.mxu1 %v1625_v45 }
  0x5e   :  { %892 = vmatpush.bf16.msra.mxu1 %v1624_v47 }
  0x61   :  { %787 = vmatmul.bf16.gmra.mxu1 %v1207_v52  ;;  %874 = vmatmul.bf16.gmra.mxu0 %v1219_v53  ;;  %v1655_v53 = vld [vmem:[%s2204_s3 + $0x38] sm:$0xff] }
  0x62   :  { %1056 = vmatpush.bf16.msra.mxu0 %v1655_v53  ;;  %1664 = vmatpush.bf16.msra.mxu2 %v1655_v53 }
  0x63   :  { %951 = vmatmul.bf16.vlgmr.msrb.gmra.mxu3 %v1167_v59 }
  0x64   :  { %922 = vmatmul.bf16.vlgmr.msrb.gmra.mxu2 %v1163_v58 }
  0x66   :  { %1057 = vmatpush.bf16.msra.mxu0 %v1654_v61  ;;  %1665 = vmatpush.bf16.msra.mxu2 %v1654_v61 }
  0x6a   :  { %1058 = vmatpush.bf16.msra.mxu0 %v1653_v2  ;;  %1666 = vmatpush.bf16.msra.mxu2 %v1653_v2 }
  0x6e   :  { %1059 = vmatpush.bf16.msra.mxu0 %v1652_v3  ;;  %1667 = vmatpush.bf16.msra.mxu2 %v1652_v3 }
  0x71   :  { %792 = vmatmul.bf16.gmra.mxu1 %v1239_v0  ;;  %879 = vmatmul.bf16.gmra.mxu0 %v1251_v1 }
  0x72   :  { %1060 = vmatpush.bf16.msra.mxu0 %v1651_v9  ;;  %1668 = vmatpush.bf16.msra.mxu2 %v1651_v9 }
  0x73   :  { %956 = vmatmul.bf16.gmra.mxu3 %v1199_v7 }
  0x74   :  { %927 = vmatmul.bf16.gmra.mxu2 %v1195_v6 }
  0x76   :  { %1061 = vmatpush.bf16.msra.mxu0 %v1650_v13  ;;  %1669 = vmatpush.bf16.msra.mxu2 %v1650_v13 }
  0x81   :  { %893 = vmatmul.bf16.vlgmr.msra.gmra.mxu1 %v1159_v10 }
  0x83   :  { %961 = vmatmul.bf16.gmra.mxu3 %v1231_v16  ;;  %v1649_v16 = vld [vmem:[%s2204_s3 + $0x8] sm:$0xff] }
  0x84   :  { %932 = vmatmul.bf16.gmra.mxu2 %v1227_v15  ;;  %1062 = vmatpush.bf16.msra.mxu0 %v1649_v16 }
  0x85   :  { %1670 = vmatpush.bf16.msra.mxu2 %v1649_v16 }
  0x91   :  { %898 = vmatmul.bf16.gmra.mxu1 %v1191_v19  ;;  %v1648_v19 = vld [vmem:[%s2204_s3] sm:$0xff] }
  0x92   :  { %1063 = vmatpush.bf16.msra.mxu0 %v1648_v19  ;;  %1671 = vmatpush.bf16.msra.mxu2 %v1648_v19 }
  0x93   :  { %966 = vmatmul.bf16.gmra.mxu3 %v1263_v25 }
  0x94   :  { %937 = vmatmul.bf16.gmra.mxu2 %v1259_v24 }
  0x9e   :  { %v759_v29 = vpop.f32.mrf.mxu1  ;;  %v749_v39 = vpop.f32.mrf.mxu0 }
  0x9f   :  { %v750_v44 = vadd.f32 %v2101_v43, %v749_v39  ;;  %v760_v4 = vadd.f32 %v2101_v43, %v759_v29 }
  0xa1   :  { %903 = vmatmul.bf16.gmra.mxu1 %v1223_v28 }
  0xa6   :  { %v2082_v30 = vpop.f32.mrf.mxu1  ;;  %v836_v32 = vpop.f32.mrf.mxu3 }
  0xa7   :  { %v807_v31 = vpop.f32.mrf.mxu2  ;;  %v751_v47 = vpop.f32.mrf.mxu0  ;;  %v762_v9 = vadd.f32 %v2101_v43, %v2082_v30 }
  0xa8   :  { %v752_v27 = vadd.f32 %v2101_v43, %v751_v47 }
  0xae   :  { %v2090_v36 = vpop.f32.mrf.mxu1  ;;  %v2094_v38 = vpop.f32.mrf.mxu3 }
  0xaf   :  { %v2092_v37 = vpop.f32.mrf.mxu2  ;;  %v754_v54 = vpop.f32.mrf.mxu0  ;;  %v765_v20 = vadd.f32 %v2101_v43, %v2090_v36 }
  0xb0   :  { %v755_v56 = vadd.f32 %v2101_v43, %v754_v54 }
  0xb1   :  { %908 = vmatmul.bf16.gmra.mxu1 %v1255_v35 }
  0xb6   :  { %v2096_v40 = vpop.f32.mrf.mxu1  ;;  %v841_v42 = vpop.f32.mrf.mxu3 }
  0xb7   :  { %v812_v41 = vpop.f32.mrf.mxu2  ;;  %v756_v11 = vpop.f32.mrf.mxu0 }
  0xbe   :  { %v778_v45 = vpop.f32.mrf.mxu1  ;;  %v2106_v50 = vpop.f32.mrf.mxu3 }
  0xbf   :  { %v779_v46 = vadd.f32 %v778_v45, %v750_v44  ;;  %v2104_v48 = vpop.f32.mrf.mxu2  ;;  %v865_v18 = vpop.f32.mrf.mxu0  ;;  %v757_v44 = vadd.f32 %v2101_v43, %v756_v11 }
  0xc1   :  { %v808_v49 = vadd.f32 %v807_v31, %v779_v46 }
  0xc3   :  { %v2108_v51 = vadd.f32 %v836_v32, %v808_v49 }
  0xc5   :  { %v866_v36 = vadd.f32 %v865_v18, %v2108_v51 }
  0xc6   :  { %v780_v52 = vpop.f32.mrf.mxu1  ;;  %v846_v57 = vpop.f32.mrf.mxu3 }
  0xc7   :  { %v817_v55 = vpop.f32.mrf.mxu2  ;;  %v867_v28 = vpop.f32.mrf.mxu0  ;;  %v781_v31 = vadd.f32 %v780_v52, %v752_v27 }
  0xc9   :  { %v810_v33 = vadd.f32 %v2092_v37, %v781_v31 }
  0xce   :  { %v783_v58 = vpop.f32.mrf.mxu1  ;;  %v2121_v1 = vpop.f32.mrf.mxu3 }
  0xcf   :  { %v784_v59 = vadd.f32 %v783_v58, %v755_v56  ;;  %v2119_v63 = vpop.f32.mrf.mxu2  ;;  %v870_v39 = vpop.f32.mrf.mxu0 }
  0xd1   :  { %v813_v60 = vadd.f32 %v812_v41, %v784_v59  ;;  %v839_v41 = vadd.f32 %v2094_v38, %v810_v33  ;;  %v767_v33 = vadd.f32 %v2101_v43, %v2096_v40 }
  0xd3   :  { %v2117_v62 = vadd.f32 %v841_v42, %v813_v60  ;;  %v868_v45 = vadd.f32 %v867_v28, %v839_v41 }
  0xd5   :  { %v871_v38 = vadd.f32 %v870_v39, %v2117_v62 }
  0xd6   :  { %v785_v0 = vpop.f32.mrf.mxu1  ;;  %v851_v8 = vpop.f32.mrf.mxu3 }
  0xd7   :  { %v822_v6 = vpop.f32.mrf.mxu2  ;;  %v786_v52 = vadd.f32 %v785_v0, %v757_v44  ;;  %v872_v37 = vpop.f32.mrf.mxu0 }
  0xd9   :  { %v815_v58 = vadd.f32 %v2104_v48, %v786_v52 }
  0xdb   :  { %v844_v3 = vadd.f32 %v2106_v50, %v815_v58 }
  0xdd   :  { %v873_v0 = vadd.f32 %v872_v37, %v844_v3 }
  0xde   :  { %v788_v5 = vpop.f32.mrf.mxu1  ;;  %v2143_v17 = vpop.f32.mrf.mxu3 }
  0xdf   :  { %v789_v7 = vadd.f32 %v788_v5, %v760_v4  ;;  %v2138_v15 = vpop.f32.mrf.mxu2 }
  0xe1   :  { %v818_v10 = vadd.f32 %v817_v55, %v789_v7 }
  0xe3   :  { %v2133_v12 = vadd.f32 %v846_v57, %v818_v10 }
  0xe6   :  { %v790_v14 = vpop.f32.mrf.mxu1  ;;  %v952_v26 = vpop.f32.mrf.mxu3 }
  0xe7   :  { %v923_v24 = vpop.f32.mrf.mxu2  ;;  %v791_v10 = vadd.f32 %v790_v14, %v762_v9 }
  0xe9   :  { %v820_v19 = vadd.f32 %v2119_v63, %v791_v10 }
  0xee   :  { %v793_v21 = vpop.f32.mrf.mxu1  ;;  %v954_v35 = vpop.f32.mrf.mxu3 }
  0xef   :  { %v794_v22 = vadd.f32 %v793_v21, %v765_v20  ;;  %v925_v32 = vpop.f32.mrf.mxu2 }
  0xf1   :  { %v823_v23 = vadd.f32 %v822_v6, %v794_v22  ;;  %v875_v6 = vpop.f32.mrf.mxu0 }
  0xf3   :  { %v2150_v25 = vadd.f32 %v851_v8, %v823_v23  ;;  %v876_v23 = vadd.f32 %v875_v6, %v2133_v12 }
  0xf6   :  { %v2153_v29 = vpop.f32.mrf.mxu1  ;;  %v957_v54 = vpop.f32.mrf.mxu3 }
  0xf7   :  { %v928_v49 = vpop.f32.mrf.mxu2 }
  0xf9   :  { %v877_v21 = vpop.f32.mrf.mxu0 }
  0xfe   :  { %v894_v34 = vpop.f32.mrf.mxu1  ;;  %v959_v5 = vpop.f32.mrf.mxu3 }
  0xff   :  { %v895_v42 = vadd.f32 %v894_v34, %v866_v36  ;;  %v930_v2 = vpop.f32.mrf.mxu2 }
 0x101   :  { %v924_v46 = vadd.f32 %v923_v24, %v895_v42  ;;  %v880_v34 = vpop.f32.mrf.mxu0 }
 0x103   :  { %v953_v55 = vadd.f32 %v952_v26, %v924_v46  ;;  %v849_v26 = vadd.f32 %v2121_v1, %v820_v19  ;;  %v881_v46 = vadd.f32 %v880_v34, %v2150_v25 }
 0x105   :  { %v972_v51 = vmax.f32 %v953_v55, 0.0  ;;  %v878_v14 = vadd.f32 %v877_v21, %v849_v26 }
 0x106   :  { %v896_v47 = vpop.f32.mrf.mxu1  ;;  %v962_v18 = vpop.f32.mrf.mxu3 }
 0x107   :  { %v897_v53 = vadd.f32 %v896_v47, %v868_v45  ;;  %v933_v16 = vpop.f32.mrf.mxu2 }
 0x109   :  { %v926_v56 = vadd.f32 %v925_v32, %v897_v53  ;;  %v882_v43 = vpop.f32.mrf.mxu0 }
 0x10b   :  { %v955_v57 = vadd.f32 %v954_v35, %v926_v56  ;;  %v796_v35 = vadd.f32 %v2153_v29, %v767_v33 }
 0x10d   :  { %v973_v59 = vmax.f32 %v955_v57, 0.0  ;;  %v825_v41 = vadd.f32 %v2138_v15, %v796_v35 }
 0x10e   :  { %v899_v60 = vpop.f32.mrf.mxu1  ;;  %v964_v31 = vpop.f32.mrf.mxu3 }
 0x10f   :  { %v988_v61 = vpack.c.bf16 %v973_v59, %v972_v51  ;;  %v900_v4 = vadd.f32 %v899_v60, %v871_v38  ;;  %v935_v30 = vpop.f32.mrf.mxu2  ;;  %v854_v53 = vadd.f32 %v2143_v17, %v825_v41  ;;  %v1673_v17 = vld [vmem:[%s2203_s4] ss:$0 sm:$0xff] }
 0x111   :  { %1064 = vmatmul.bf16.vlgmr.msra.gmra.mxu0 %v988_v61  ;;  %v929_v7 = vadd.f32 %v928_v49, %v900_v4 }
 0x113   :  { %v958_v13 = vadd.f32 %v957_v54, %v929_v7  ;;  %v883_v54 = vadd.f32 %v882_v43, %v854_v53 }
 0x115   :  { %v974_v50 = vmax.f32 %v958_v13, 0.0 }
 0x116   :  { %v901_v8 = vpop.f32.mrf.mxu1  ;;  %v967_v49 = vpop.f32.mrf.mxu3 }
 0x117   :  { %v902_v48 = vadd.f32 %v901_v8, %v873_v0  ;;  %v938_v44 = vpop.f32.mrf.mxu2 }
 0x119   :  { %v931_v11 = vadd.f32 %v930_v2, %v902_v48 }
 0x11b   :  { %v960_v62 = vadd.f32 %v959_v5, %v931_v11 }
 0x11d   :  { %v975_v20 = vmax.f32 %v960_v62, 0.0 }
 0x11e   :  { %v904_v22 = vpop.f32.mrf.mxu1  ;;  %v969_v57 = vpop.f32.mrf.mxu3 }
 0x11f   :  { %v989_v24 = vpack.c.bf16 %v975_v20, %v974_v50  ;;  %v905_v27 = vadd.f32 %v904_v22, %v876_v23  ;;  %v940_v56 = vpop.f32.mrf.mxu2 }
 0x121   :  { %1069 = vmatmul.bf16.gmra.mxu0 %v989_v24  ;;  %v934_v28 = vadd.f32 %v933_v16, %v905_v27 }
 0x123   :  { %v963_v39 = vadd.f32 %v962_v18, %v934_v28 }
 0x125   :  { %v976_v1 = vmax.f32 %v963_v39, 0.0 }
 0x126   :  { %v906_v32 = vpop.f32.mrf.mxu1 }
 0x127   :  { %v907_v63 = vadd.f32 %v906_v32, %v878_v14 }
 0x129   :  { %v936_v36 = vadd.f32 %v935_v30, %v907_v63 }
 0x12b   :  { %v965_v12 = vadd.f32 %v964_v31, %v936_v36 }
 0x12d   :  { %v977_v42 = vmax.f32 %v965_v12, 0.0 }
 0x12e   :  { %v909_v45 = vpop.f32.mrf.mxu1 }
 0x12f   :  { %v990_v47 = vpack.c.bf16 %v977_v42, %v976_v1  ;;  %v910_v40 = vadd.f32 %v909_v45, %v881_v46 }
 0x131   :  { %1074 = vmatmul.bf16.gmra.mxu0 %v990_v47  ;;  %v939_v29 = vadd.f32 %v938_v44, %v910_v40 }
 0x133   :  { %v968_v37 = vadd.f32 %v967_v49, %v939_v29 }
 0x135   :  { %v978_v51 = vmax.f32 %v968_v37, 0.0 }
 0x136   :  { %v911_v52 = vpop.f32.mrf.mxu1 }
 0x137   :  { %v912_v55 = vadd.f32 %v911_v52, %v883_v54 }
 0x139   :  { %v941_v15 = vadd.f32 %v940_v56, %v912_v55 }
 0x13b   :  { %v970_v58 = vadd.f32 %v969_v57, %v941_v15 }
 0x13d   :  { %v979_v59 = vmax.f32 %v970_v58, 0.0 }
 0x13f   :  { %v991_v60 = vpack.c.bf16 %v979_v59, %v978_v51 }
 0x141   :  { %1079 = vmatmul.bf16.vlgmr.msra.gmra.mxu2 %v991_v60 }
 0x18e   :  { %v1065_v25 = vpop.f32.mrf.mxu0 }
 0x18f   :  { %v1116_v38 = vadd.f32 %v1673_v17, %v1065_v25 }
 0x191   :  { %1124 = vst [vmem:[%s2205_s5] sm:$0xff] %v1116_v38 }
 0x196   :  { %v1067_v61 = vpop.f32.mrf.mxu0 }
 0x197   :  { %v1117_v2 = vadd.f32 %v1673_v17, %v1067_v61 }
 0x199   :  { %1125 = vst [vmem:[%s2205_s5 + $0x8] sm:$0xff] %v1117_v2 }
 0x19e   :  { %v1070_v3 = vpop.f32.mrf.mxu0 }
 0x19f   :  { %v1118_v4 = vadd.f32 %v1673_v17, %v1070_v3 }
 0x1a1   :  { %1126 = vst [vmem:[%s2205_s5 + $0x10] sm:$0xff] %v1118_v4 }
 0x1a6   :  { %v1072_v5 = vpop.f32.mrf.mxu0 }
 0x1a7   :  { %v1119_v6 = vadd.f32 %v1673_v17, %v1072_v5 }
 0x1a9   :  { %1127 = vst [vmem:[%s2205_s5 + $0x18] sm:$0xff] %v1119_v6 }
 0x1ae   :  { %v1075_v0 = vpop.f32.mrf.mxu0 }
 0x1af   :  { %v1120_v7 = vadd.f32 %v1673_v17, %v1075_v0 }
 0x1b1   :  { %1128 = vst [vmem:[%s2205_s5 + $0x20] sm:$0xff] %v1120_v7 }
 0x1b6   :  { %v1077_v8 = vpop.f32.mrf.mxu0 }
 0x1b7   :  { %v1121_v9 = vadd.f32 %v1673_v17, %v1077_v8 }
 0x1b9   :  { %1129 = vst [vmem:[%s2205_s5 + $0x28] sm:$0xff] %v1121_v9 }
 0x1c4   :  { %v1080_v48 = vpop.f32.mrf.mxu2 }
 0x1c5   :  { %v1122_v10 = vadd.f32 %v1673_v17, %v1080_v48 }
 0x1c7   :  { %1130 = vst [vmem:[%s2205_s5 + $0x30] sm:$0xff] %v1122_v10 }
 0x1cc   :  { %v1082_v11 = vpop.f32.mrf.mxu2 }
 0x1cd   :  { %v1123_v13 = vadd.f32 %v1673_v17, %v1082_v11 }
 0x1cf   :  { %1131 = vst [vmem:[%s2205_s5 + $0x38] sm:$0xff] %v1123_v13 }

</bundles_post_ra>
